<compile_context>
chip_gen: v6e
topology: v6e:2x2x1
jax: 0.10.0
libtpu: 0.0.40
codegen_flags: <defaults>
</compile_context>

<pallas_src>
import math

import jax
import jax.numpy as jnp
from jax.experimental import pallas as pl
from jax.experimental.pallas import tpu as pltpu

UNIFORM_RANGE = 0.3  # matches FeatureNoise(uniform_range=0.3)


def feature_noise_kernel(noise_ref, x_ref, o_ref):
    # noise_ref: (1, f_tile) float32 per-feature noise, shared over the batch.
    # x_ref / o_ref: (n_tile, f_tile) tile of the input / output.
    x = x_ref[...]
    o_ref[...] = (x * noise_ref[...] + x).astype(o_ref.dtype)


def _choose_tiles(N, F, itemsize, target_block_bytes):
    """Pick (n_tile, f_tile): lane-dense, (8,128)-legal, ~target_block_bytes."""
    # Lane axis first: as wide as possible while leaving room for >= 8 sublanes.
    max_f_bytes = max(128 * itemsize, target_block_bytes // 8)
    if F * itemsize <= max_f_bytes:
        f_tile = F                                    # full feature axis (legal)
    else:
        f_tile = max(128, (max_f_bytes // (128 * itemsize)) * 128)

    # Sublane axis: fill the remaining budget with a multiple of 8 (or full N).
    rows_budget = max(8, target_block_bytes // max(1, f_tile * itemsize))
    if N <= rows_budget:
        n_tile = N                                    # full batch axis (legal)
    else:
        n_tile = max(8, (rows_budget // 8) * 8)

    # Ensure the "parallel" grid has >= 2 blocks when feasible so the second
    # v7x TensorCore is not left idle on single-block inputs.
    if pl.cdiv(N, n_tile) * pl.cdiv(F, f_tile) < 2 and F >= 256:
        half = -(-F // 2)
        f_tile = max(128, -(-half // 128) * 128)      # lane-dense half split

    return n_tile, f_tile


def feature_noise(x, key, uniform_range=UNIFORM_RANGE,
                  target_block_bytes=4 * 1024 * 1024,
                  alias_input=False):
    """x: (N, ...) array. Returns x * noise + x with per-feature noise shared
    across the batch dimension (same semantics as the PyTorch FeatureNoise)."""
    assert x.ndim >= 2, "FeatureNoise expects a batched input"
    orig_shape = x.shape
    N = orig_shape[0]
    feat_shape = orig_shape[1:]
    F = int(math.prod(feat_shape))

    # One uniform(-r, r) draw per feature position (torch samples x.shape[1:]
    # once and broadcasts over batch). Kept in f32 so low-precision inputs do
    # not round the noise before the multiply.
    noise = jax.random.uniform(key, feat_shape, dtype=jnp.float32,
                               minval=-uniform_range, maxval=uniform_range)
    noise = noise.reshape(1, F)

    xf = x.reshape(N, F)
    itemsize = jnp.dtype(x.dtype).itemsize

    n_tile, f_tile = _choose_tiles(N, F, itemsize, target_block_bytes)
    grid = (pl.cdiv(N, n_tile), pl.cdiv(F, f_tile))

    # Explicit VMEM budget: double-buffered x + out blocks, noise block, slack.
    block_bytes = n_tile * f_tile * itemsize
    noise_bytes = f_tile * 4
    vmem_limit = int(min(max(4 * block_bytes + 4 * noise_bytes + (2 << 20),
                             16 << 20),
                         48 << 20))

    cost = pl.CostEstimate(flops=2 * N * F, transcendentals=0,
                           bytes_accessed=2 * N * F * itemsize + F * 4)

    # TODO(synk): for tiny batches (N < 8) a plain-jnp path or in-kernel PRNG
    # (pltpu.prng_seed / pltpu.sample_block) would avoid the extra F of HBM
    # traffic for the materialized noise row; kept off so the kernel always runs.
    out = pl.pallas_call(
        feature_noise_kernel,
        out_shape=jax.ShapeDtypeStruct((N, F), x.dtype),
        grid=grid,
        in_specs=[
            pl.BlockSpec((1, f_tile), lambda i, j: (0, j)),       # shared noise
            pl.BlockSpec((n_tile, f_tile), lambda i, j: (i, j)),  # x tile
        ],
        out_specs=pl.BlockSpec((n_tile, f_tile), lambda i, j: (i, j)),
        compiler_params=pltpu.CompilerParams(
            dimension_semantics=("parallel", "parallel"),
            vmem_limit_bytes=vmem_limit),
        cost_estimate=cost,
        input_output_aliases=({1: 0} if alias_input else {}),
    )(noise, xf)

    return out.reshape(orig_shape)


if __name__ == "__main__":
    key = jax.random.PRNGKey(0)
    x_key, noise_key = jax.random.split(key)

    N, C, H, W = 2, 4, 16, 16
    x = jax.random.normal(x_key, (N, C, H, W), dtype=jnp.float32)

    y = feature_noise(x, noise_key)
    y = jax.block_until_ready(y)

    # Pure-JAX reference (same key & shape -> identical noise draw).
    noise_ref = jax.random.uniform(noise_key, (C, H, W), dtype=jnp.float32,
                                   minval=-UNIFORM_RANGE, maxval=UNIFORM_RANGE)
    y_ref = x * noise_ref[None, ...] + x

    # 1) Matches the reference computation.
    assert y.shape == x.shape and y.dtype == x.dtype
    assert bool(jnp.allclose(y, y_ref, atol=1e-6, rtol=1e-6))
    # 2) Noise magnitude bounded by uniform_range.
    assert bool(jnp.all(jnp.abs(y - x) <= UNIFORM_RANGE * jnp.abs(x) + 1e-6))
    # 3) The same multiplicative noise is applied to every batch element.
    mask = jnp.abs(x[0] * x[1]) > 1e-3
    n0 = jnp.where(mask, (y[0] - x[0]) / jnp.where(mask, x[0], 1.0), 0.0)
    n1 = jnp.where(mask, (y[1] - x[1]) / jnp.where(mask, x[1], 1.0), 0.0)
    assert bool(jnp.allclose(n0, n1, atol=1e-4))

    print("KERNEL_OK")
</pallas_src>

<mosaic_0001>
module attributes {stable_mosaic.version = 11 : i64} {
  func.func @feature_noise_kernel(%arg0: i32, %arg1: i32, %arg2: memref<1x512xf32, #tpu.memory_space<vmem>>, %arg3: memref<2x512xf32, #tpu.memory_space<vmem>>, %arg4: memref<2x512xf32, #tpu.memory_space<vmem>>) attributes {dimension_semantics = [#tpu.dimension_semantics<parallel>, #tpu.dimension_semantics<parallel>], iteration_bounds = array<i64: 1, 2>, scalar_prefetch = 0 : i64, scratch_operands = 0 : i64, tpu.core_type = #tpu.core_type<tc>, window_params = [{transform_indices = @transform_0, window_bounds = array<i64: 1, 512>}, {transform_indices = @transform_1, window_bounds = array<i64: 2, 512>}, {transform_indices = @transform_2, window_bounds = array<i64: 2, 512>}]} {
    %c0 = arith.constant 0 : index
    %c0_0 = arith.constant 0 : index
    %0 = vector.load %arg3[%c0, %c0_0] : memref<2x512xf32, #tpu.memory_space<vmem>>, vector<2x512xf32>
    %c0_1 = arith.constant 0 : index
    %c0_2 = arith.constant 0 : index
    %1 = vector.load %arg2[%c0_1, %c0_2] : memref<1x512xf32, #tpu.memory_space<vmem>>, vector<1x512xf32>
    %2 = vector.broadcast %1 : vector<1x512xf32> to vector<2x512xf32>
    %3 = arith.mulf %0, %2 : vector<2x512xf32>
    %4 = arith.addf %3, %0 : vector<2x512xf32>
    %c0_3 = arith.constant 0 : index
    %c0_4 = arith.constant 0 : index
    %5 = vector.load %arg4[%c0_3, %c0_4] : memref<2x512xf32, #tpu.memory_space<vmem>>, vector<2x512xf32>
    tpu.vector_store %arg4[%c0_3, %c0_4], %4 {strides = array<i32>} : memref<2x512xf32, #tpu.memory_space<vmem>>, vector<2x512xf32>,
    return
  }
  func.func @transform_0(%arg0: i32, %arg1: i32) -> (i32, i32) {
    %c0_i32 = arith.constant 0 : i32
    %c0_i32_0 = arith.constant 0 : i32
    return %c0_i32, %arg1 : i32, i32
  }
  func.func @transform_1(%arg0: i32, %arg1: i32) -> (i32, i32) {
    %c0_i32 = arith.constant 0 : i32
    return %arg0, %arg1 : i32, i32
  }
  func.func @transform_2(%arg0: i32, %arg1: i32) -> (i32, i32) {
    %c0_i32 = arith.constant 0 : i32
    return %arg0, %arg1 : i32, i32
  }
}

</mosaic_0001>

<bundles_post_ra>
// kernel: tpu_custom_call.1
= control target key start
LH: loop header
LB: loop body
LE: loop exit
PB: predicated region body
PF: predicated region fallthrough
CT: control target
= control target key end

     0   :  { %7 = vsyncpa [#allocation3], 0  ;;  %s798_s0 = inlined_call_operand.hbm [shape: f32[1,1024], index: 0, kind: input, shape index: {}]   ;;  %s799_s1 = inlined_call_operand.hbm [shape: f32[2,1024], index: 1, kind: input, shape index: {}]   ;;  %s800_s2 = inlined_call_operand.hbm [shape: f32[2,1024], index: 2, kind: output, shape index: {}]  }
   0x1   :  { %9 = vsyncpa [#allocation3 + $0x1], 0 }
   0x2   :  { %10 = vsyncpa [#allocation6], 0 }
   0x3   :  { %12 = vsyncpa [#allocation6 + $0x1], 0 }
   0x4   :  { %13 = vsyncpa [#allocation4], 0 }
   0x5   :  { %15 = vsyncpa [#allocation4 + $0x1], 0  ;;  %s634_s9 = smov 0   ;;  %s636_s10 = smov 0  }
   0x6   :  { %s638_s11 = smov 0   ;;  %s640_s12 = smov 0  }
   0x7   :  { %s642_s13 = smov 0   ;;  %s644_s14 = smov 0  }
   0x8 LB: > { %s383_s15 = sadd.s32 4294967295, %s613_s14   ;;  %s384_s16 = sadd.s32 4294967294, %s613_s14   ;;  %s613_s14 = sphi %s644_s14, %s21_s14   ;;  %s609_s13 = sphi %s642_s13, %s812_s13   ;;  %s605_s12 = sphi %s640_s12, %s811_s12   ;;  %s601_s11 = sphi %s638_s11, %s810_s11   ;;  %s597_s10 = sphi %s636_s10, %s809_s10   ;;  %s593_s9 = sphi %s634_s9, %s808_s9  }
   0x9   : > { %s30_s17 = sadd.s32 1, %s609_s13  ;;  %s40_s18 = sadd.s32 1, %s601_s11 }
   0xa   : > { %p31_p0 = scmp.ge.s32.totalorder %s30_s17, 2  ;;  %p47_p1 = scmp.ne.s32.totalorder %s601_s11, %s597_s10 }
   0xb   : > { %p48_p2 = scmp.eq.s32.totalorder %s613_s14, 0  ;;  %p53_p3 = scmp.ne.s32.totalorder %s597_s10, %s593_s9 }
   0xc   : > { %s814_s17 = smov (%p31_p0, %s30_s17), 0  ;;  %p54_p5 = scmp.eq.s32.totalorder %s383_s15, 0 }
   0xd   : > { %p675_p4 = por %p48_p2, %p47_p1  ;;  %s37_s20 = ssub.s32 %s609_s13, %s814_s17 }
   0xe   : > { %p107_p6 = scmp.eq.s32.totalorder %s383_s15, 1  ;;  %p38_p7 = scmp.eq.s32.totalorder %s37_s20, 0 }
   0xf   : > { %p681_p8 = por %p54_p5, %p53_p3  ;;  %p113_p10 = scmp.eq.s32.totalorder %s384_s16, 1 }
  0x10   : > { %p685_p9 = por %p107_p6, %p47_p1  ;;  %p422_p13 = scmp.lt.s32.totalorder %s613_s14, 2 }
  0x11   : > { %s690_s23 = scalar_select %p38_p7, %s601_s11, %s40_s18  }
  0x12   : > { %p692_p11 = por %p113_p10, %p53_p3  ;;  %s699_s25 = sand.u32 1, %s601_s11  }
  0x13   : > { %s387_s26 = sshll.u32 %s699_s25, 2  ;;  %s402_s27 = sshll.u32 %s609_s13, 6 }
  0x14   : > { %s143_s30 = scalar_lea.hbm %s798_s0, %s402_s27  ;;  %s137_s3 = scalar_lea.vmem [#allocation2], %s387_s26 }
  0x15   : > { %s145_s4 = sshll.u32 %s137_s3, 4  ;;  %p708_p0 = pnand %p422_p13, %p675_p4  ;;  %s146_s4 = int_to_ptr.vmem [resolvable:$true] %s145_s4 }
  0x16   : > { %p393_p1 = scmp.ge.s32.totalorder %s613_s14, 1  ;;  %p171_p2 = scmp.lt.s32.totalorder %s613_s14, 3 }
  0x17   : > { %s134_s6 = scalar_lea.sflag [#allocation3], %s699_s25  ;;  %p475_p3 = pneg %p708_p0 }
  0x18   : > { %s486_s7 = scalar_lea.vmem %s146_s4, 64  ;;  %s615_s8 = smov [#allocation2]  }
  0x19   : > { %p487_p5 = scmp.ne.s32.totalorder %s146_s4, %s486_s7  ;;  %s491_s15 = sshll.u32 %s615_s8, 4  ;;  %s492_s15 = int_to_ptr.vmem [resolvable:$false] %s491_s15 }
  0x1a   : > { %s493_s16 = scalar_lea.vmem %s492_s15, 128  ;;  %p494_p4 = scmp.lt.s32.totalorder %s146_s4, %s492_s15 }
  0x1b   : > { %p489_p6 = pnand %p487_p5, %p475_p3  ;;  %p495_p10 = scmp.lt.s32.totalorder %s493_s16, %s486_s7 }
  0x1d   : > { %p490_p7 = pneg %p489_p6  ;;  %p496_p13 = por %p495_p10, %p494_p4 }
  0x1f   : > { %p497_p12 = pnand %p496_p13, %p490_p7 }
  0x21   : > { %500 = shalt.err (!%p497_p12)
}
  0x22   : > { %414 = dma.hbm_to_vmem [thread:$0]  (!%p708_p0), %s143_s30, 64, %s146_s4, %s134_s6  }
  0x23   : > { %p726_p5 = pnand %p393_p1, %p171_p2  ;;  %s390_s19 = sshll.u32 %s699_s25, 3 }
  0x24   : > { %s403_s20 = sshll.u32 %s609_s13, 7  ;;  %s156_s29 = scalar_lea.vmem [#allocation5], %s390_s19 }
  0x25   : > { %s164_s28 = scalar_lea.hbm %s799_s1, %s403_s20  ;;  %s166_s3 = sshll.u32 %s156_s29, 4  ;;  %s167_s3 = int_to_ptr.vmem [resolvable:$true] %s166_s3 }
  0x26   : > { %s153_s7 = scalar_lea.sflag [#allocation6], %s699_s25  ;;  %s514_s8 = scalar_lea.vmem %s167_s3, 128 }
  0x27   : > { %p515_p12 = scmp.ne.s32.totalorder %s167_s3, %s514_s8  ;;  %s616_s30 = smov [#allocation5]  }
  0x28   : > { %s519_s4 = sshll.u32 %s616_s30, 4  ;;  %s520_s4 = int_to_ptr.vmem [resolvable:$false] %s519_s4 }
  0x29   : > { %p517_p6 = pnand %p515_p12, %p475_p3  ;;  %s521_s6 = scalar_lea.vmem %s520_s4, 256 }
  0x2a   : > { %p522_p1 = scmp.lt.s32.totalorder %s167_s3, %s520_s4  ;;  %p523_p2 = scmp.lt.s32.totalorder %s521_s6, %s514_s8 }
  0x2b   : > { %p518_p7 = pneg %p517_p6 }
  0x2c   : > { %p524_p4 = por %p523_p2, %p522_p1 }
  0x2e   : > { %p525_p10 = pnand %p524_p4, %p518_p7 }
  0x30   : > { %528 = shalt.err (!%p525_p10)
}
  0x31   : > { %417 = dma.hbm_to_vmem [thread:$0]  (!%p708_p0), %s164_s28, 128, %s167_s3, %s153_s7  }
  0x32   : > { %175 = sbr.rel (%p726_p5) target bundleno = 90 (0x5a), region = 28  ;;  %s744_s25 = sand.u32 (!%p726_p5), 1, %s597_s10  }
  0x33   : > { %s394_s15 = sshll.u32 (!%p726_p5), %s744_s25, 2  ;;  %s178_s16 = scalar_lea.sflag (!%p726_p5), [#allocation3], %s744_s25 }
  0x34   : > { %s181_s19 = scalar_lea.vmem (!%p726_p5), [#allocation2], %s394_s15 }
  0x37   : > { %580 = dma.done.wait (%p681_p8), %s178_s16, 64  }
  0x38   : > { %582 = vsyncadd (%p681_p8), %s178_s16, 4294967232  ;;  %s395_s5 = sshll.u32 %s744_s25, 3  ;;  %s187_s18 = scalar_lea.sflag [#allocation6], %s744_s25 }
  0x39   : > { %s190_s20 = scalar_lea.vmem [#allocation5], %s395_s5 }
  0x3a   : > { %584 = dma.done.wait (%p681_p8), %s187_s18, 128  }
  0x3b   : > { %586 = vsyncadd (%p681_p8), %s187_s18, 4294967168  ;;  %v222_v0 = vlaneseq  ;;  %v617_v1 = vmov 1983009808   ;;  %v220_v9 = vld [vmem:[%s181_s19] sm:$0xf]  ;;  %v219_v19 = vld [vmem:[%s190_s20] sm:$0xff] }
  0x3c   : > { %v241_v2 = vunpack.c.l.s4 %v617_v1  ;;  %s215_s21 = scalar_lea.vmem [#allocation7], %s395_s5  ;;  %s404_s27 = sshll.u32 %s605_s12, 7 }
  0x3d   : > { %v223_v3 = vshrl.u32 %v222_v0, 7  ;;  %s276_s26 = sshll.u32 %s215_s21, 4  ;;  %s274_s3 = scalar_lea.hbm %s800_s2, %s404_s27  ;;  %s277_s26 = int_to_ptr.vmem [resolvable:$true] %s276_s26 }
  0x3e   : > { %v242_v4 = vunpack.c.0.s8 %v241_v2  ;;  %s260_s7 = scalar_lea.sflag [#allocation4], %s744_s25  ;;  %s529_s8 = scalar_lea.vmem %s277_s26, 128 }
  0x3f   : > { %v224_v5 = vsub.s32 0, %v223_v3  ;;  %v228_v6 = vsub.s32 1, %v223_v3  ;;  %v232_v7 = vsub.s32 2, %v223_v3  ;;  %v236_v8 = vsub.s32 3, %v223_v3  ;;  %p530_p8 = scmp.ne.s32.totalorder %s277_s26, %s529_s8  ;;  %s618_s30 = smov [#allocation7]  }
  0x40   : > { %v245_v10 = vsub.s32 %v242_v4, %v223_v3  ;;  %s533_s4 = sshll.u32 %s618_s30, 4  ;;  %s534_s4 = int_to_ptr.vmem [resolvable:$false] %s533_s4 }
  0x41   : > { %v225_v11 = vrot.slane %v220_v9, %v224_v5  ;;  %v229_v12 = vrot.slane %v220_v9, %v228_v6  ;;  %v233_v13 = vrot.slane %v220_v9, %v232_v7  ;;  %v237_v14 = vrot.slane %v220_v9, %v236_v8  ;;  %p531_p0 = pnand %p530_p8, %p685_p9  ;;  %s535_s6 = scalar_lea.vmem %s534_s4, 256 }
  0x42   : > { %p536_p13 = scmp.lt.s32.totalorder %s277_s26, %s534_s4  ;;  %p537_p5 = scmp.lt.s32.totalorder %s535_s6, %s529_s8 }
  0x43   : > { %v238_v15 = vcombine.low %v225_v11, %v229_v12  ;;  %v239_v16 = vcombine.low %v233_v13, %v237_v14  ;;  %p532_p3 = pneg %p531_p0 }
  0x44   : > { %p538_p12 = por %p537_p5, %p536_p13 }
  0x45   : > { %v246_v17 = vrot.slane %v238_v15, %v245_v10  ;;  %v253_v18 = vrot.slane %v239_v16, %v245_v10 }
  0x46   : > { %p539_p6 = pnand %p538_p12, %p532_p3 }
  0x47   : > { %v254_v20 = vcombine.low %v246_v17, %v253_v18 }
  0x49   : > { %v256_v21 = vmul.f32 %v254_v20, %v219_v19 }
  0x4b   : > { %v257_v22 = vadd.f32 %v256_v21, %v219_v19 }
  0x4d   : > { %258 = vst [vmem:[%s215_s21] sm:$0xff] %v257_v22 }
  0x4e   : > { %542 = shalt.err (!%p539_p6)
}
  0x4f   : > { %s543_s12 = scalar_lea.hbm %s274_s3, 128  ;;  %s547_s16 = scalar_lea.hbm %s800_s2, 256 }
  0x50   : > { %p544_p7 = scmp.ne.s32.totalorder %s274_s3, %s543_s12  ;;  %p548_p4 = scmp.lt.s32.totalorder %s274_s3, %s800_s2 }
  0x51   : > { %p549_p10 = scmp.lt.s32.totalorder %s547_s16, %s543_s12 }
  0x52   : > { %p545_p1 = pnand %p544_p7, %p685_p9 }
  0x53   : > { %p550_p8 = por %p549_p10, %p548_p4 }
  0x54   : > { %p546_p2 = pneg %p545_p1 }
  0x56   : > { %p551_p0 = pnand %p550_p8, %p546_p2 }
  0x58   : > { %554 = shalt.err (!%p551_p0)
}
  0x59   : > { %409 = dma.vmem_to_hbm [thread:$0]  (%p685_p9), %s277_s26, 128, %s274_s3, %s260_s7  }
  0x5a PF: > { %s288_s18 = sand.u32 1, %s593_s9   ;;  %p807_p3 = scmp.ge.s32.totalorder %s613_s14, 2 }
  0x5b   : > { %s289_s20 = scalar_lea.sflag [#allocation4], %s288_s18 }
  0x5c   : > { %p419_p13 = pnand %p807_p3, %p692_p11 }
  0x5e   : > { %p420_p5 = pneg %p419_p13 }
  0x60   : > { %588 = dma.done.wait (%p420_p5), %s289_s20, 128  }
  0x61   : > { %590 = vsyncadd (%p420_p5), %s289_s20, 4294967168  ;;  %s21_s14 = sadd.s32 1, %s613_s14   ;;  %s808_s9 = smov %s597_s10 }
  0x62   : > { %p18_p12 = scmp.ge.s32.totalorder %s21_s14, 4   ;;  %s809_s10 = smov %s601_s11 }
  0x63   : > { %s810_s11 = smov %s690_s23  ;;  %s811_s12 = smov %s609_s13 }
  0x64   : > { %s812_s13 = smov %s814_s17  ;;  %20 = sbr.rel (!%p18_p12) target bundleno = 8 (0x8), region = 86 }
  0x69   :  { %294 = vsyncpa [#allocation3], 1 }
  0x6a   :  { %296 = vsyncpa [#allocation3 + $0x1], 1 }
  0x6b   :  { %297 = vsyncpa [#allocation6], 1 }
  0x6c   :  { %299 = vsyncpa [#allocation6 + $0x1], 1 }
  0x6d   :  { %300 = vsyncpa [#allocation4], 1 }
  0x6e   :  { %302 = vsyncpa [#allocation4 + $0x1], 1 }

</bundles_post_ra>
